<compile_context>
chip_gen: v6e
topology: v6e:2x2x1
jax: 0.10.0
libtpu: 0.0.40
codegen_flags: <defaults>
</compile_context>

<pallas_src>
import functools

import jax
import jax.numpy as jnp
from jax import lax
from jax.experimental import pallas as pl
from jax.experimental.pallas import tpu as pltpu

_EPS_PAIRWISE = 1e-6     # torch F.pairwise_distance eps (added to every diff component)
_EPS_NORMALIZE = 1e-12   # torch F.normalize clamp_min
_BIG = 1e30              # "masked out" sentinel for min reductions


def _softplus(z):
    # numerically stable log(1 + exp(z)); matches the reference formula for the in-range z here.
    return jnp.maximum(z, 0.0) + jnp.log(1.0 + jnp.exp(-jnp.abs(z)))


def _resident_spec(block_shape, index_map):
    """BlockSpec for a block whose index never changes: request a single buffer if supported."""
    try:
        return pl.BlockSpec(block_shape, index_map, pipeline_mode=pl.Buffered(1))
    except Exception:
        return pl.BlockSpec(block_shape, index_map)


def _vmem_limit_bytes():
    cap = 64 * 1024 * 1024
    try:
        cap = int(getattr(pltpu.get_tpu_info(), "vmem_capacity_bytes", cap))
    except Exception:
        pass
    # Leave headroom: ~100 MiB on 128 MiB parts (v5e/v6e), ~48 MiB on v7x's 64 MiB per core.
    return int(min(cap - 16 * 1024 * 1024, 100 * 1024 * 1024))


# --------------------------------------------------------------------------------------------
# Kernel 1: per-sample class centroids and class sizes, chunked over the "member" axis.
# --------------------------------------------------------------------------------------------
def _centroid_kernel(li_ref, ljc_ref, f_ref, cent_ref, cnt_ref, *, n_real, kc, mm_dtype):
    c = pl.program_id(0)

    @pl.when(c == 0)
    def _():
        cent_ref[...] = jnp.zeros_like(cent_ref)
        cnt_ref[...] = jnp.zeros_like(cnt_ref)

    col_ids = lax.broadcasted_iota(jnp.int32, (1, kc), 1) + c * kc
    col_ok = col_ids < n_real
    m = jnp.logical_and(li_ref[...] == ljc_ref[...], col_ok)        # (B, Kc) label-match mask
    cnt_ref[...] += jnp.sum(m.astype(jnp.float32), axis=1, keepdims=True)
    cent_ref[...] += lax.dot_general(m.astype(mm_dtype), f_ref[...].astype(mm_dtype),
                                     (((1,), (0,)), ((), ())),
                                     preferred_element_type=jnp.float32)

    @pl.when(c == pl.num_programs(0) - 1)
    def _():
        cent_ref[...] = cent_ref[...] / jnp.maximum(cnt_ref[...], 1.0)


# --------------------------------------------------------------------------------------------
# Kernel 2: one anchor-row tile vs the full batch; fully independent per-tile partial sums.
# --------------------------------------------------------------------------------------------
def _loss_tile_kernel(f_t_ref, c_t_ref, li_t_ref, cnt_t_ref, cat_ref, lj_ref, stats_ref, out_ref,
                      *, n_real, tile, b_pad, d, t_trip, t_cent):
    r0 = pl.program_id(0) * tile
    eps = _EPS_PAIRWISE
    d_eps2 = float(d) * eps * eps

    f_t = f_t_ref[...]                           # (T, D) normalized anchor rows, f32
    li_t = li_t_ref[...]                         # (T, 1) int32 anchor labels
    cnt_t = cnt_t_ref[...]                       # (T, 1) class size incl. self (real cols only)
    lj = lj_ref[...]                             # (1, B) int32 labels as a row
    fn2c = stats_ref[0:1, :]                     # (1, B) ||f_j||^2
    cn2c = stats_ref[1:2, :]                     # (1, B) ||C_j||^2
    col_ok = stats_ref[2:3, :] > 0.5             # (1, B) real-column mask

    row_ids = lax.broadcasted_iota(jnp.int32, (tile, 1), 0) + r0     # (T, 1)
    col_ids = lax.broadcasted_iota(jnp.int32, (1, b_pad), 1)         # (1, B)
    row_ok = row_ids < n_real
    n_neg = float(n_real) - cnt_t
    valid = jnp.logical_and(row_ok, jnp.logical_and(cnt_t > 1.0, n_neg > 0.0))

    same_lbl = li_t == lj                                            # (T, B)
    same_noself = jnp.logical_and(jnp.logical_and(same_lbl, col_ok), col_ids != row_ids)
    neg_mask = jnp.logical_and(jnp.logical_not(same_lbl), col_ok)

    fn2_t = jnp.sum(f_t * f_t, axis=1, keepdims=True)                # (T, 1)

    # One fused Gram matmul on the MXU: (T, D) x (D, 2B) against the packed [fnorm ; cent].
    gall = lax.dot_general(f_t.astype(cat_ref.dtype), cat_ref[...],
                           (((1,), (1,)), ((), ())),
                           preferred_element_type=jnp.float32)        # (T, 2B)
    d2 = jnp.maximum(fn2_t + fn2c - 2.0 * gall[:, :b_pad], 0.0)       # anchor-to-sample
    dc2 = jnp.maximum(fn2_t + cn2c - 2.0 * gall[:, b_pad:], 0.0)      # anchor-to-centroid (clamped)

    # ---------------- Triplet loss ----------------
    # TODO(synk): reference samples the positive with random.choice; we take the nearest positive.
    # TODO(synk): torch pairwise_distance eps cross-term 2*eps*sum(a-b) is dropped for the
    #             Gram-form distances (only the D*eps^2 constant is kept); effect is ~1e-6.
    dp2_t = jnp.min(jnp.where(same_noself, d2, _BIG), axis=1, keepdims=True)
    dn2_t = jnp.min(jnp.where(neg_mask, d2, _BIG), axis=1, keepdims=True)   # hardest negative
    z_t = (jnp.sqrt(dp2_t + d_eps2) - jnp.sqrt(dn2_t + d_eps2)) / t_trip
    per_trip = jnp.where(valid, _softplus(z_t), 0.0)

    # ---------------- Centroid loss ----------------
    c_own = c_t_ref[...]                                             # (T, D) own-class centroid
    c_p = (c_own * cnt_t - f_t) / jnp.maximum(cnt_t - 1.0, 1.0)      # leave-one-out pos centroid
    pd = f_t - c_p
    dp2_c = (jnp.sum(pd * pd, axis=1, keepdims=True)
             + 2.0 * eps * jnp.sum(pd, axis=1, keepdims=True) + d_eps2)   # full torch eps here
    dn2_c = jnp.min(jnp.where(neg_mask, dc2, _BIG), axis=1, keepdims=True)
    z_c = (jnp.sqrt(jnp.maximum(dp2_c, 0.0)) - jnp.sqrt(dn2_c + d_eps2)) / t_cent
    per_cent = jnp.where(valid, _softplus(z_c), 0.0)

    # Per-tile partial sums broadcast across the lanes of their sublane row (lane-dense store).
    sub = lax.broadcasted_iota(jnp.int32, (8, 128), 0)
    out_ref[...] = jnp.where(sub == 0, jnp.sum(per_trip),
                   jnp.where(sub == 1, jnp.sum(per_cent),
                   jnp.where(sub == 2, jnp.sum(valid.astype(jnp.float32)), 0.0)))


# --------------------------------------------------------------------------------------------
# Wrapper: CombinedLoss.forward(features, labels, epoch) -> scalar float32
# --------------------------------------------------------------------------------------------
def combined_loss(features, labels, epoch,
                  triplet_loss_weight=1.0, centroid_loss_weight=0.0005,
                  triplet_temperature=0.3, centroid_temperature=0.3,
                  row_tile=256, use_bf16_matmul=True):
    features = jnp.asarray(features, jnp.float32)
    labels = jnp.asarray(labels, jnp.int32)
    b, d = features.shape
    assert row_tile % 128 == 0, "row_tile must be a multiple of 128"
    # TODO(synk): on v7x with very large batches drop row_tile to 128 to bound live (T,B) temps.
    tile = row_tile if b >= row_tile else ((b + 7) // 8) * 8
    b_pad = ((b + tile - 1) // tile) * tile
    n_tiles = b_pad // tile
    mm_dtype = jnp.bfloat16 if use_bf16_matmul else jnp.float32
    vmem_limit = _vmem_limit_bytes()

    # F.normalize(features, p=2, dim=1): wrapper glue so raw features never sit resident in VMEM.
    nrm = jnp.sqrt(jnp.sum(features * features, axis=1, keepdims=True))
    f = features / jnp.maximum(nrm, _EPS_NORMALIZE)
    if b_pad != b:
        f = jnp.pad(f, ((0, b_pad - b), (0, 0)))
        labels = jnp.pad(labels, (0, b_pad - b), constant_values=-1)
    li = labels.reshape(b_pad, 1)
    lj = labels.reshape(1, b_pad)

    # ---- kernel 1: per-sample class centroids + class sizes (column-chunked accumulation) ----
    kc = tile
    cent, cnt = pl.pallas_call(
        functools.partial(_centroid_kernel, n_real=int(b), kc=int(kc), mm_dtype=mm_dtype),
        out_shape=(jax.ShapeDtypeStruct((b_pad, d), jnp.float32),
                   jax.ShapeDtypeStruct((b_pad, 1), jnp.float32)),
        grid_spec=pltpu.PrefetchScalarGridSpec(
            num_scalar_prefetch=0,
            grid=(b_pad // kc,),
            in_specs=[
                _resident_spec((b_pad, 1), lambda c: (0, 0)),   # labels as a column (resident)
                pl.BlockSpec((1, kc), lambda c: (0, c)),        # label row chunk
                pl.BlockSpec((kc, d), lambda c: (c, 0)),        # normalized-feature row chunk
            ],
            out_specs=(pl.BlockSpec((b_pad, d), lambda c: (0, 0)),    # centroid accumulator
                       pl.BlockSpec((b_pad, 1), lambda c: (0, 0))),   # class-size accumulator
        ),
        compiler_params=pltpu.CompilerParams(
            dimension_semantics=("arbitrary",), vmem_limit_bytes=vmem_limit),
    )(li, lj, f)

    # Packed per-column stats + fused matmul operand (tiny wrapper glue).
    stats = jnp.zeros((8, b_pad), jnp.float32)
    stats = stats.at[0].set(jnp.sum(f * f, axis=1))                       # ||f_j||^2
    stats = stats.at[1].set(jnp.sum(cent * cent, axis=1))                 # ||C_j||^2
    stats = stats.at[2].set((jnp.arange(b_pad) < b).astype(jnp.float32))  # real-column mask
    cat = jnp.concatenate([f, cent], axis=0).astype(mm_dtype)             # (2B, D) [fnorm ; cent]

    # Temperatures depend only on the (static) epoch hyperparameter.
    t_trip = min(triplet_temperature + 0.04 * epoch, 1.0)
    t_cent = min(centroid_temperature + 0.02 * epoch, 1.0)

    # ---- kernel 2: per-anchor-tile losses; independent tiles (megacore "parallel") ----
    partials = pl.pallas_call(
        functools.partial(_loss_tile_kernel, n_real=int(b), tile=int(tile), b_pad=int(b_pad),
                          d=int(d), t_trip=float(t_trip), t_cent=float(t_cent)),
        out_shape=jax.ShapeDtypeStruct((n_tiles * 8, 128), jnp.float32),
        grid_spec=pltpu.PrefetchScalarGridSpec(
            num_scalar_prefetch=0,
            grid=(n_tiles,),
            in_specs=[
                pl.BlockSpec((tile, d), lambda i: (i, 0)),         # normalized anchor rows
                pl.BlockSpec((tile, d), lambda i: (i, 0)),         # own-class centroid rows
                pl.BlockSpec((tile, 1), lambda i: (i, 0)),         # anchor labels
                pl.BlockSpec((tile, 1), lambda i: (i, 0)),         # anchor class sizes
                _resident_spec((2 * b_pad, d), lambda i: (0, 0)),  # [fnorm ; cent] Gram operand
                _resident_spec((1, b_pad), lambda i: (0, 0)),      # labels as a row
                _resident_spec((8, b_pad), lambda i: (0, 0)),      # packed column stats
            ],
            out_specs=pl.BlockSpec((8, 128), lambda i: (i, 0)),
        ),
        compiler_params=pltpu.CompilerParams(
            dimension_semantics=("parallel",), vmem_limit_bytes=vmem_limit),
    )(f, cent, li, cnt, cat, lj, stats)

    per_tile = partials.reshape(n_tiles, 8, 128)[:, :3, 0]   # rows: [trip_sum, cent_sum, count]
    trip_sum = jnp.sum(per_tile[:, 0])
    cent_sum = jnp.sum(per_tile[:, 1])
    count = jnp.sum(per_tile[:, 2])
    denom = jnp.maximum(count, 1.0)          # count == 0 -> both reference losses are 0
    return (triplet_loss_weight * (trip_sum / denom)
            + centroid_loss_weight * (cent_sum / denom))


if __name__ == "__main__":
    key = jax.random.PRNGKey(0)
    B, D = 8, 128
    features = jax.random.normal(key, (B, D), dtype=jnp.float32)
    labels = jnp.array([0, 0, 1, 1, 2, 2, 3, 3], dtype=jnp.int32)
    epoch = 2

    loss = combined_loss(features, labels, epoch)
    jax.block_until_ready(loss)
    assert bool(jnp.isfinite(loss)), "loss is not finite"
    print("KERNEL_OK")
</pallas_src>

<mosaic_0001>
module attributes {stable_mosaic.version = 11 : i64} {
  func.func @_centroid_kernel(%arg0: i32, %arg1: memref<8x1xi32, #tpu.memory_space<vmem>>, %arg2: memref<1x8xi32, #tpu.memory_space<vmem>>, %arg3: memref<8x128xf32, #tpu.memory_space<vmem>>, %arg4: memref<8x128xf32, #tpu.memory_space<vmem>>, %arg5: memref<8x1xf32, #tpu.memory_space<vmem>>) attributes {dimension_semantics = [#tpu.dimension_semantics<arbitrary>], iteration_bounds = array<i64: 1>, scalar_prefetch = 0 : i64, scratch_operands = 0 : i64, tpu.core_type = #tpu.core_type<tc>, window_params = [{pipeline_mode = #tpu.pipeline_mode<synchronous>, transform_indices = @transform_0, window_bounds = array<i64: 8, 1>}, {transform_indices = @transform_1, window_bounds = array<i64: 1, 8>}, {transform_indices = @transform_2, window_bounds = array<i64: 8, 128>}, {pipeline_mode = #tpu.pipeline_mode<synchronous>, transform_indices = @transform_3, window_bounds = array<i64: 8, 128>}, {pipeline_mode = #tpu.pipeline_mode<synchronous>, transform_indices = @transform_4, window_bounds = array<i64: 8, 1>}]} {
    %c0_i32 = arith.constant 0 : i32
    %0 = arith.cmpi eq, %arg0, %c0_i32 : i32
    %1 = arith.extui %0 : i1 to i32
    %c0_i32_0 = arith.constant 0 : i32
    %2 = arith.cmpi ne, %1, %c0_i32_0 : i32
    scf.if %2 {
      %cst_18 = arith.constant 0.000000e+00 : f32
      %35 = vector.broadcast %cst_18 : f32 to vector<8x128xf32>
      %c0_19 = arith.constant 0 : index
      %c0_20 = arith.constant 0 : index
      %36 = vector.load %arg4[%c0_19, %c0_20] : memref<8x128xf32, #tpu.memory_space<vmem>>, vector<8x128xf32>
      tpu.vector_store %arg4[%c0_19, %c0_20], %35 {strides = array<i32>} : memref<8x128xf32, #tpu.memory_space<vmem>>, vector<8x128xf32>,
      %cst_21 = arith.constant 0.000000e+00 : f32
      %37 = vector.broadcast %cst_21 : f32 to vector<8x1xf32>
      %c0_22 = arith.constant 0 : index
      %c0_23 = arith.constant 0 : index
      %38 = vector.load %arg5[%c0_22, %c0_23] : memref<8x1xf32, #tpu.memory_space<vmem>>, vector<8x1xf32>
      tpu.vector_store %arg5[%c0_22, %c0_23], %37 {strides = array<i32>} : memref<8x1xf32, #tpu.memory_space<vmem>>, vector<8x1xf32>,
    } else {
    }
    %3 = tpu.iota {dimensions = array<i32: 1>} : vector<1x8xi32>
    %c8_i32 = arith.constant 8 : i32
    %4 = arith.muli %arg0, %c8_i32 : i32
    %5 = vector.broadcast %4 : i32 to vector<1x8xi32>
    %6 = arith.addi %3, %5 : vector<1x8xi32>
    %c8_i32_1 = arith.constant 8 : i32
    %7 = vector.broadcast %c8_i32_1 : i32 to vector<1x8xi32>
    %8 = arith.cmpi slt, %6, %7 : vector<1x8xi32>
    %c0 = arith.constant 0 : index
    %c0_2 = arith.constant 0 : index
    %9 = vector.load %arg1[%c0, %c0_2] : memref<8x1xi32, #tpu.memory_space<vmem>>, vector<8x1xi32>
    %c0_3 = arith.constant 0 : index
    %c0_4 = arith.constant 0 : index
    %10 = vector.load %arg2[%c0_3, %c0_4] : memref<1x8xi32, #tpu.memory_space<vmem>>, vector<1x8xi32>
    %11 = vector.broadcast %9 : vector<8x1xi32> to vector<8x8xi32>
    %12 = vector.broadcast %10 : vector<1x8xi32> to vector<8x8xi32>
    %13 = arith.cmpi eq, %11, %12 : vector<8x8xi32>
    %14 = vector.broadcast %8 : vector<1x8xi1> to vector<8x8xi1>
    %15 = arith.andi %13, %14 : vector<8x8xi1>
    %c0_5 = arith.constant 0 : index
    %c0_6 = arith.constant 0 : index
    %16 = vector.load %arg5[%c0_5, %c0_6] : memref<8x1xf32, #tpu.memory_space<vmem>>, vector<8x1xf32>
    %17 = arith.extui %15 : vector<8x8xi1> to vector<8x8xi32>
    %18 = arith.sitofp %17 : vector<8x8xi32> to vector<8x8xf32>
    %cst = arith.constant dense<0.000000e+00> : vector<8xf32>
    %19 = vector.multi_reduction <add>, %18, %cst [1] : vector<8x8xf32> to vector<8xf32>
    %20 = vector.shape_cast %19 : vector<8xf32> to vector<8x1xf32>
    %21 = arith.addf %16, %20 : vector<8x1xf32>
    %c0_7 = arith.constant 0 : index
    %c0_8 = arith.constant 0 : index
    %22 = vector.load %arg5[%c0_7, %c0_8] : memref<8x1xf32, #tpu.memory_space<vmem>>, vector<8x1xf32>
    tpu.vector_store %arg5[%c0_7, %c0_8], %21 {strides = array<i32>} : memref<8x1xf32, #tpu.memory_space<vmem>>, vector<8x1xf32>,
    %c0_9 = arith.constant 0 : index
    %c0_10 = arith.constant 0 : index
    %23 = vector.load %arg4[%c0_9, %c0_10] : memref<8x128xf32, #tpu.memory_space<vmem>>, vector<8x128xf32>
    %24 = arith.extui %15 : vector<8x8xi1> to vector<8x8xi32>
    %25 = arith.sitofp %24 : vector<8x8xi32> to vector<8x8xf32>
    %26 = arith.truncf %25 : vector<8x8xf32> to vector<8x8xbf16>
    %c0_11 = arith.constant 0 : index
    %c0_12 = arith.constant 0 : index
    %27 = vector.load %arg3[%c0_11, %c0_12] : memref<8x128xf32, #tpu.memory_space<vmem>>, vector<8x128xf32>
    %28 = arith.truncf %27 : vector<8x128xf32> to vector<8x128xbf16>
    %cst_13 = arith.constant dense<0.000000e+00> : vector<8x128xf32>
    %29 = tpu.matmul %26, %28, %cst_13 {dimension_numbers = #tpu.dot_dimension_numbers<[1], [0], [0], [1], [0, 0, 1, 1], [], []>} : vector<8x8xbf16>, vector<8x128xbf16>, vector<8x128xf32> -> vector<8x128xf32>
    %30 = arith.addf %23, %29 : vector<8x128xf32>
    %c0_14 = arith.constant 0 : index
    %c0_15 = arith.constant 0 : index
    %31 = vector.load %arg4[%c0_14, %c0_15] : memref<8x128xf32, #tpu.memory_space<vmem>>, vector<8x128xf32>
    tpu.vector_store %arg4[%c0_14, %c0_15], %30 {strides = array<i32>} : memref<8x128xf32, #tpu.memory_space<vmem>>, vector<8x128xf32>,
    %c0_i32_16 = arith.constant 0 : i32
    %32 = arith.cmpi eq, %arg0, %c0_i32_16 : i32
    %33 = arith.extui %32 : i1 to i32
    %c0_i32_17 = arith.constant 0 : i32
    %34 = arith.cmpi ne, %33, %c0_i32_17 : i32
    scf.if %34 {
      %c0_18 = arith.constant 0 : index
      %c0_19 = arith.constant 0 : index
      %35 = vector.load %arg4[%c0_18, %c0_19] : memref<8x128xf32, #tpu.memory_space<vmem>>, vector<8x128xf32>
      %c0_20 = arith.constant 0 : index
      %c0_21 = arith.constant 0 : index
      %36 = vector.load %arg5[%c0_20, %c0_21] : memref<8x1xf32, #tpu.memory_space<vmem>>, vector<8x1xf32>
      %cst_22 = arith.constant 1.000000e+00 : f32
      %37 = vector.broadcast %cst_22 : f32 to vector<8x1xf32>
      %38 = arith.maximumf %36, %37 : vector<8x1xf32>
      %39 = vector.broadcast %38 : vector<8x1xf32> to vector<8x128xf32>
      %40 = arith.divf %35, %39 : vector<8x128xf32>
      %c0_23 = arith.constant 0 : index
      %c0_24 = arith.constant 0 : index
      %41 = vector.load %arg4[%c0_23, %c0_24] : memref<8x128xf32, #tpu.memory_space<vmem>>, vector<8x128xf32>
      tpu.vector_store %arg4[%c0_23, %c0_24], %40 {strides = array<i32>} : memref<8x128xf32, #tpu.memory_space<vmem>>, vector<8x128xf32>,
    } else {
    }
    return
  }
  func.func @transform_0(%arg0: i32) -> (i32, i32) {
    %c0_i32 = arith.constant 0 : i32
    %c0_i32_0 = arith.constant 0 : i32
    %c0_i32_1 = arith.constant 0 : i32
    return %c0_i32, %c0_i32_0 : i32, i32
  }
  func.func @transform_1(%arg0: i32) -> (i32, i32) {
    %c0_i32 = arith.constant 0 : i32
    %c0_i32_0 = arith.constant 0 : i32
    return %c0_i32, %arg0 : i32, i32
  }
  func.func @transform_2(%arg0: i32) -> (i32, i32) {
    %c0_i32 = arith.constant 0 : i32
    %c0_i32_0 = arith.constant 0 : i32
    return %arg0, %c0_i32 : i32, i32
  }
  func.func @transform_3(%arg0: i32) -> (i32, i32) {
    %c0_i32 = arith.constant 0 : i32
    %c0_i32_0 = arith.constant 0 : i32
    %c0_i32_1 = arith.constant 0 : i32
    return %c0_i32, %c0_i32_0 : i32, i32
  }
  func.func @transform_4(%arg0: i32) -> (i32, i32) {
    %c0_i32 = arith.constant 0 : i32
    %c0_i32_0 = arith.constant 0 : i32
    %c0_i32_1 = arith.constant 0 : i32
    return %c0_i32, %c0_i32_0 : i32, i32
  }
}

</mosaic_0001>

<bundles_post_ra>
// kernel: tpu_custom_call.1
= control target key start
LH: loop header
LB: loop body
LE: loop exit
PB: predicated region body
PF: predicated region fallthrough
CT: control target
= control target key end

     0   :  { %v180_v2 = vmov 0   ;;  %v181_v3 = vmov 0.0   ;;  %vm61_vm0 = vcmask 1043456   ;;  %s235_s0 = inlined_call_operand.vmem [shape: s32[8,1], index: 0, kind: input, shape index: {}]   ;;  %s236_s1 = inlined_call_operand.vmem [shape: s32[1,8], index: 1, kind: input, shape index: {}]   ;;  %s237_s2 = inlined_call_operand.vmem [shape: f32[8,128], index: 2, kind: input, shape index: {}]   ;;  %s238_s3 = inlined_call_operand.hbm [shape: f32[8,128], index: 3, kind: output, shape index: {0}]   ;;  %s239_s4 = inlined_call_operand.vmem [shape: f32[8,1], index: 4, kind: output, shape index: {1}]  }
   0x1   :  { %v31_v0 = vld [vmem:[%s235_s0] sm:$0xff]  ;;  %154 = vset.pattern.permute.xlu0 %v180_v2  ;;  %144 = vmatprep.subr.bf16.mxu0 %v181_v3 }
   0x2   :  { %v56_v1 = vld [vmem:[%s237_s2] sm:$0xff] }
   0x3   :  { %v57_v4 = vpack.c.bf16 %v56_v1, %v56_v1 }
   0x4   :  { %10 = vsyncpa [#allocation3], 0  ;;  %34 = vperm.xlu0 %154, %v31_v0   ;;  %vm182_vm1 = vmmov 0   ;;  %vm23_vm2 = vcmask 7168   ;;  %155 = vset.pattern.permute.xlu1 %v180_v2  ;;  %v25_v6 = vlaneseq  ;;  %v139_v8 = vld [vmem:[%s236_s1] ss:$0 sm:$0xff] }
   0x5   :  { %146 = vmatprep.mubr.msk.bf16.mxu0 %vm182_vm1, %v181_v3  ;;  %v63_v5 = vsel %vm61_vm0, %v57_v4, 0  ;;  %24 = vst.msk [vmem:[%s239_s4] sm:$0xff] %vm23_vm2, %v181_v3  ;;  %vm47_vm5 = vcmask 64512   ;;  %s183_s26 = smov [#allocation2]  }
   0x6   :  { %145 = vmatpush3.bf16.msra.mxu0 %v63_v5  ;;  %v26_v7 = vand.u32 127, %v25_v6  ;;  %s127_s27 = sshll.u32 %s183_s26, 4  ;;  %s128_s27 = int_to_ptr.vmem [resolvable:$true] %s127_s27 }
   0x7   :  { %s158_s28 = scalar_lea.vmem %s128_s27, 128  ;;  %p163_p1 = scmp.lt.s32.totalorder %s128_s27, %s128_s27 }
   0x8   :  { %vm30_vm3 = vcmp.lt.s32.totalorder %v26_v7, 8  ;;  %p159_p0 = scmp.ne.s32.totalorder %s128_s27, %s158_s28  ;;  %p164_p2 = scmp.lt.s32.totalorder %s158_s28, %s158_s28 }
   0xa   :  { %p165_p3 = por %p164_p2, %p163_p1 }
   0xc   :  { %v44_v13 = vld [vmem:[%s239_s4] sm:$0xff]  ;;  %p166_p4 = pnand %p165_p3, %p159_p0 }
  0x7f   :  { %v35_v9 = vpop.permute.xlu0 %34 }
  0x80   :  { %vm40_vm4 = vcmp.eq.s32.totalorder %v35_v9, %v139_v8 }
  0x81   :  { %vm43_vm6 = vmand %vm40_vm4, %vm30_vm3 }
  0x82   :  { %v140_v10 = vsel %vm43_vm6, 1.0, %v181_v3 }
  0x83   :  { %v48_v11 = vsel %vm47_vm5, %v140_v10, 0.0  ;;  %v55_v12 = vpack.c.bf16 %v140_v10, %v140_v10 }
  0x84   :  { %49 = vadd.xlane.f32.xlu0 %v48_v11 }
  0x85   :  { %147 = vmatmul.mubr.msk.bf16.vlgmr.msra.gmra.mxu0 %vm47_vm5, %v55_v12 }
 0x10d   :  { %v50_v14 = vpop.xlane.xlu0 %49 }
 0x10e   :  { %v51_v15 = vadd.f32 %v50_v14, %v44_v13 }
 0x110   :  { %53 = vst.msk [vmem:[%s239_s4] sm:$0xff] %vm23_vm2, %v51_v15 }
 0x117   :  { %v111_v16 = vld [vmem:[%s239_s4] sm:$0xff] }
 0x118   :  { %v112_v17 = vmax.f32 %v111_v16, 1.0 }
 0x11a   :  { %115 = vperm.xlu1 %155, %v112_v17  }
 0x145   :  { %v99_v18 = vpop.f32.mrf.mxu0 }
 0x147   :  { %v148_v19 = vpop.f32.mrf.mxu0 }
 0x149   :  { %v102_v20 = vpop.f32.mrf.mxu0 }
 0x14b   :  { %v149_v21 = vpop.f32.mrf.mxu0 }
 0x195   :  { %v116_v22 = vpop.permute.xlu1 %115 }
 0x196   :  { %156 = vrcp.f32 %v116_v22 }
 0x1a3   :  { %v157_v23 = vpop.eup %156 }
 0x1a4   :  { %v119_v24 = vmul.f32 %v157_v23, %v99_v18 }
 0x1a6   :  { %120 = vst [vmem:[#allocation2] sm:$0xff] %v119_v24 }
 0x1a7   :  { %169 = shalt.err (!%p166_p4)
}
 0x1a8   :  { %130 = dma.vmem_to_hbm [thread:$0]  %s128_s27, 128, %s238_s3, [#allocation3]  }
 0x1a9   :  { %178 = dma.done.wait [#allocation3], 128  }
 0x1aa   :  { %179 = vsyncadd [#allocation3], 4294967168 }
 0x1ab   :  { %138 = vsyncpa [#allocation3], 1 }

</bundles_post_ra>
